<compile_context>
chip_gen: v5e
topology: v5e:2x2
jax: 0.10.0
libtpu: 0.0.40
codegen_flags: <defaults>
</compile_context>

<pallas_src>
import functools

import jax
import jax.numpy as jnp
from jax.experimental import pallas as pl
from jax.experimental.pallas import tpu as pltpu


def _perceptron_kernel(x_ref, w_ref, b_ref, o_ref, *, dk):
    """x_ref: (TB, D) VMEM, w_ref: (1, D) VMEM, b_ref: (1,) SMEM, o_ref: (1, TB) VMEM."""
    tb, d = x_ref.shape
    n_chunks = d // dk  # wrapper guarantees dk divides d (or dk == d)

    def partial_dot(off):
        # Upcast per chunk (no-op for f32 inputs; keeps v5e, which lacks bf16 VPU/EUP,
        # safe when bf16 x is fed through without a wrapper-side convert).
        xc = x_ref[:, pl.ds(off, dk)].astype(jnp.float32)       # (TB, dk)
        wc = w_ref[:, pl.ds(off, dk)].astype(jnp.float32)       # (1, dk) broadcasts on VPU
        return jnp.sum(xc * wc, axis=-1)                        # XLU lane reduce -> (TB,)

    # Chunked accumulation over D keeps intermediates to (TB, dk) instead of (TB, D).
    # Static Python offsets -> aligned static slices (zero lowering risk, zero runtime
    # cost); the accumulation chain serializes the chunks.
    # TODO(synk): for very large chunk counts, switch to lax.fori_loop(unroll=True) to
    # also bound live ranges for the scheduler.
    z = partial_dot(0)
    for c in range(1, n_chunks):
        z = z + partial_dot(c * dk)

    z = z + b_ref[0]                              # scalar bias from SMEM
    s = pl.reciprocal(1.0 + jnp.exp(-z))          # sigmoid: exp rides the EUP; exact recip
    o_ref[...] = s[None, :].astype(o_ref.dtype)   # lane-dense (1, TB) store


def _choose_d_chunk(d, max_chunk=512):
    """Largest 128-multiple chunk (<= max_chunk) dividing D; whole-D reduce otherwise."""
    if d <= max_chunk:
        return d
    for dk in (512, 384, 256, 128):
        if dk <= max_chunk and d % dk == 0:
            return dk
    return d  # ragged D: fall back to a single whole-row reduce


def _choose_batch_tile(b, d, itemsize, tile_budget_bytes):
    """Rows per batch tile from a byte budget (amortizes ~0.35us per-grid-step overhead)."""
    rows = max(tile_budget_bytes // (itemsize * d), 128)
    if rows >= b:
        if b >= 1024:
            # Worth splitting across v7x's two TensorCores: ~half the batch per tile,
            # rounded to 128 rows -> a 2-tile "parallel" grid.
            return (pl.cdiv(b, 2) + 127) // 128 * 128
        return b  # single tile == full array shape (always a legal block shape)
    return max(rows // 128 * 128, 128)


def perceptron_forward(x, weight, bias, *, tile_budget_bytes=6 << 20, d_chunk=None):
    """x: (B, D), weight: (1, D), bias: (1,) -> (B,) f32 == sigmoid(x @ W.T + b).squeeze()."""
    b, d = x.shape
    weight = weight.reshape(1, d)
    bias = bias.reshape(1)

    tb = _choose_batch_tile(b, d, jnp.dtype(x.dtype).itemsize, tile_budget_bytes)
    dk = d_chunk if d_chunk is not None else _choose_d_chunk(d)
    if d % dk != 0:
        dk = d
    grid = pl.cdiv(b, tb)

    # TODO(synk): for extremely large D (where even a 128-row tile exceeds the VMEM
    # budget), add a trailing "arbitrary" D grid axis with a (1, tb) f32 VMEM accumulator
    # (init/finalize via pl.when) instead of letting the minimum tile grow.
    out = pl.pallas_call(
        functools.partial(_perceptron_kernel, dk=dk),
        out_shape=jax.ShapeDtypeStruct((1, b), jnp.float32),
        grid_spec=pltpu.PrefetchScalarGridSpec(
            num_scalar_prefetch=0,
            grid=(grid,),
            in_specs=[
                pl.BlockSpec((tb, d), lambda i: (i, 0)),            # x: pipelined batch tiles
                pl.BlockSpec((1, d), lambda i: (0, 0)),             # weight row: stays resident
                pl.BlockSpec(memory_space=pltpu.MemorySpace.SMEM),  # bias: scalar in SMEM
            ],
            out_specs=pl.BlockSpec((1, tb), lambda i: (0, i)),      # lane-dense output slab
        ),
        compiler_params=pltpu.CompilerParams(
            # Disjoint output tiles per step -> safe to shard across v7x's 2 TensorCores.
            dimension_semantics=("parallel",),
            # Above v5e (16 MiB) / v6e (32 MiB) scoped defaults, below v7x 64 MiB physical.
            vmem_limit_bytes=48 * 1024 * 1024,
        ),
    )(x, weight, bias)

    # Matches torch .squeeze() for B > 1: (1, B) -> (B,)
    return out[0]


if __name__ == "__main__":
    def make_inputs(key, b, d):
        kx, kw, kb = jax.random.split(key, 3)
        x = jax.random.normal(kx, (b, d), dtype=jnp.float32)
        # Deterministic init mimicking nn.Linear default: U(-1/sqrt(D), 1/sqrt(D))
        bound = 1.0 / jnp.sqrt(jnp.float32(d))
        w = jax.random.uniform(kw, (1, d), minval=-bound, maxval=bound, dtype=jnp.float32)
        bb = jax.random.uniform(kb, (1,), minval=-bound, maxval=bound, dtype=jnp.float32)
        return x, w, bb

    # 1) Module-sized case: batch=8, input_dim=32 (single full-array tile).
    x, w, bb = make_inputs(jax.random.PRNGKey(0), 8, 32)
    y = perceptron_forward(x, w, bb)
    jax.block_until_ready(y)
    ref = jax.nn.sigmoid(x @ w.T + bb)[:, 0]
    assert y.shape == (8,)
    assert jnp.allclose(y, ref, atol=1e-5), "mismatch (B=8, D=32)"

    # 2) Chunked-D reduce path (D=256 reduced in 128-lane chunks), single tile.
    x, w, bb = make_inputs(jax.random.PRNGKey(1), 300, 256)
    y = perceptron_forward(x, w, bb, d_chunk=128)
    jax.block_until_ready(y)
    ref = jax.nn.sigmoid(x @ w.T + bb)[:, 0]
    assert y.shape == (300,)
    assert jnp.allclose(y, ref, atol=1e-5), "mismatch (B=300, D=256, chunked D)"

    # 3) Multi-tile grid with a partial tail block (no wrapper-side padding of x).
    x, w, bb = make_inputs(jax.random.PRNGKey(2), 300, 32)
    y = perceptron_forward(x, w, bb, tile_budget_bytes=128 * 32 * 4)  # forces tb=128, grid=3
    jax.block_until_ready(y)
    ref = jax.nn.sigmoid(x @ w.T + bb)[:, 0]
    assert y.shape == (300,)
    assert jnp.allclose(y, ref, atol=1e-5), "mismatch (B=300, D=32, partial tail tile)"

    print("KERNEL_OK")
</pallas_src>

<mosaic_0001>
module attributes {stable_mosaic.version = 11 : i64} {
  func.func @_perceptron_kernel(%arg0: i32, %arg1: memref<8x32xf32, #tpu.memory_space<vmem>>, %arg2: memref<1x32xf32, #tpu.memory_space<vmem>>, %arg3: memref<1xf32, #tpu.memory_space<smem>>, %arg4: memref<1x8xf32, #tpu.memory_space<vmem>>) attributes {dimension_semantics = [#tpu.dimension_semantics<parallel>], iteration_bounds = array<i64: 1>, scalar_prefetch = 0 : i64, scratch_operands = 0 : i64, tpu.core_type = #tpu.core_type<tc>, window_params = [{transform_indices = @transform_0, window_bounds = array<i64: 8, 32>}, {pipeline_mode = #tpu.pipeline_mode<synchronous>, transform_indices = @transform_1, window_bounds = array<i64: 1, 32>}, {transform_indices = @transform_2, window_bounds = array<i64: 1>}, {transform_indices = @transform_3, window_bounds = array<i64: 1, 8>}]} {
    %c0 = arith.constant 0 : index
    %c0_0 = arith.constant 0 : index
    %0 = vector.load %arg1[%c0, %c0_0] : memref<8x32xf32, #tpu.memory_space<vmem>>, vector<8x32xf32>
    %c0_1 = arith.constant 0 : index
    %c0_2 = arith.constant 0 : index
    %1 = vector.load %arg2[%c0_1, %c0_2] : memref<1x32xf32, #tpu.memory_space<vmem>>, vector<1x32xf32>
    %2 = vector.broadcast %1 : vector<1x32xf32> to vector<8x32xf32>
    %3 = arith.mulf %0, %2 : vector<8x32xf32>
    %cst = arith.constant dense<0.000000e+00> : vector<8xf32>
    %4 = vector.multi_reduction <add>, %3, %cst [1] : vector<8x32xf32> to vector<8xf32>
    %c0_3 = arith.constant 0 : index
    %5 = memref.load %arg3[%c0_3] : memref<1xf32, #tpu.memory_space<smem>>
    %6 = vector.broadcast %5 : f32 to vector<8xf32>
    %7 = arith.addf %4, %6 : vector<8xf32>
    %cst_4 = arith.constant 0.000000e+00 : f32
    %8 = vector.broadcast %cst_4 : f32 to vector<8xf32>
    %9 = arith.subf %8, %7 : vector<8xf32>
    %10 = math.exp %9 : vector<8xf32>
    %cst_5 = arith.constant 1.000000e+00 : f32
    %11 = vector.broadcast %cst_5 : f32 to vector<8xf32>
    %12 = arith.addf %11, %10 : vector<8xf32>
    %13 = tpu.reciprocal %12 : vector<8xf32> -> vector<8xf32>
    %14 = vector.shape_cast %13 : vector<8xf32> to vector<1x8xf32>
    %c0_6 = arith.constant 0 : index
    %c0_7 = arith.constant 0 : index
    %15 = vector.load %arg4[%c0_6, %c0_7] : memref<1x8xf32, #tpu.memory_space<vmem>>, vector<1x8xf32>
    tpu.vector_store %arg4[%c0_6, %c0_7], %14 {strides = array<i32>} : memref<1x8xf32, #tpu.memory_space<vmem>>, vector<1x8xf32>,
    return
  }
  func.func @transform_0(%arg0: i32) -> (i32, i32) {
    %c0_i32 = arith.constant 0 : i32
    %c0_i32_0 = arith.constant 0 : i32
    return %arg0, %c0_i32 : i32, i32
  }
  func.func @transform_1(%arg0: i32) -> (i32, i32) {
    %c0_i32 = arith.constant 0 : i32
    %c0_i32_0 = arith.constant 0 : i32
    %c0_i32_1 = arith.constant 0 : i32
    return %c0_i32, %c0_i32_0 : i32, i32
  }
  func.func @transform_2(%arg0: i32) -> i32 {
    %c0_i32 = arith.constant 0 : i32
    %c0_i32_0 = arith.constant 0 : i32
    return %c0_i32 : i32
  }
  func.func @transform_3(%arg0: i32) -> (i32, i32) {
    %c0_i32 = arith.constant 0 : i32
    %c0_i32_0 = arith.constant 0 : i32
    return %c0_i32, %arg0 : i32, i32
  }
}

</mosaic_0001>

<bundles_post_ra>
// kernel: tpu_custom_call.1
= control target key start
LH: loop header
LB: loop body
LE: loop exit
PB: predicated region body
PF: predicated region fallthrough
CT: control target
= control target key end

     0   :  { %9 = vsyncpa [#allocation4], 0  ;;  %s178_s0 = inlined_call_operand.hbm [shape: f32[8,32], index: 0, kind: input, shape index: {}]   ;;  %s179_s1 = inlined_call_operand.vmem [shape: f32[1,32], index: 1, kind: input, shape index: {}]   ;;  %s180_s2 = inlined_call_operand.<no memory space> [shape: f32[1], index: 2, kind: input, shape index: {}]   ;;  %s181_s3 = inlined_call_operand.hbm [shape: f32[1,8], index: 3, kind: output, shape index: {}]  }
   0x1   :  { %10 = vsyncpa [#allocation5], 0  ;;  %s16_s14 = sshll.u32 %s178_s0, 4  ;;  %s144_s15 = smov [#allocation3]   ;;  %s17_s14 = int_to_ptr.hbm [resolvable:$true] %s16_s14 }
   0x2   :  { %s18_s16 = sshll.u32 %s144_s15, 4  ;;  %s19_s16 = int_to_ptr.vmem [resolvable:$true] %s18_s16 }
   0x3   :  { %21 = dma.hbm_to_vmem [thread:$0]  %s17_s14, 128, %s19_s16, [#allocation4]  }
   0x4   :  { %140 = dma.done.wait [#allocation4], 128  }
   0x5   :  { %141 = vsyncadd [#allocation4], 4294967168  ;;  %v30_v0 = vld [vmem:[#allocation3] sm:$0xff]  ;;  %vm36_vm0 = vcmask 261120   ;;  %v41_v4 = vstv %s180_s2  ;;  %v62_v14 = vlaneseq  ;;  %s145_s0 = smov [#allocation6]   ;;  %s75_s22 = sshll.u32 %s181_s3, 4  ;;  %s76_s22 = int_to_ptr.hbm [resolvable:$true] %s75_s22 }
   0x6   :  { %v87_v1 = vld [vmem:[%s179_s1] ss:$0 sm:$0xff]  ;;  %s73_s1 = sshll.u32 %s145_s0, 4  ;;  %vm66_vm5 = vcmask 57344   ;;  %s74_s1 = int_to_ptr.vmem [resolvable:$true] %s73_s1 }
   0x7   :  { %v35_v2 = vmul.f32 %v87_v1, %v30_v0  ;;  %v63_v19 = vand.u32 127, %v62_v14 }
   0x9   :  { %v37_v3 = vsel %vm36_vm0, %v35_v2, 0.0 }
   0xa   :  { %38 = vadd.xlane.f32.xlu0 %v37_v3 }
  0x7d   :  { %v39_v5 = vpop.xlane.xlu0 %38 }
  0x7e   :  { %v42_v6 = vadd.f32 %v41_v4, %v39_v5 }
  0x80   :  { %v43_v7 = vsub.f32 0.0, %v42_v6 }
  0x82   :  { %v44_v8 = vmul.f32 1.442695, %v43_v7 }
  0x84   :  { %88 = vpow2.f32 %v44_v8 }
  0x8a   :  { %v89_v9 = vpop.eup %88 }
  0x8b   :  { %v46_v10 = vadd.f32 1.0, %v89_v9 }
  0x8d   :  { %90 = vrcp.f32 %v46_v10  ;;  %v58_v15 = vand.u32 2147483648, %v46_v10  ;;  %v56_v17 = vand.u32 2147483647, %v46_v10  ;;  %vm52_vm2 = vweird.f32 %v46_v10 }
  0x8f   :  { %v59_v20 = vor.u32 1.1754944e-38, %v58_v15  ;;  %vm57_vm4 = vcmp.eq.f32.partialorder %v56_v17, 8.507059e+37 }
  0x93   :  { %v91_v11 = vpop.eup %90 }
  0x94   :  { %v48_v12 = vmul.f32 %v91_v11, %v46_v10  ;;  %vm53_vm1 = vweird.f32 %v91_v11 }
  0x95   :  { %vm54_vm3 = vmor %vm52_vm2, %vm53_vm1 }
  0x96   :  { %v49_v13 = vsub.f32 1.0, %v48_v12 }
  0x98   :  { %v50_v16 = vmul.f32 %v91_v11, %v49_v13 }
  0x9a   :  { %v51_v18 = vadd.f32 %v91_v11, %v50_v16 }
  0x9c   :  { %v55_v21 = vsel %vm54_vm3, %v91_v11, %v51_v18 }
  0x9d   :  { %v60_v22 = vsel %vm57_vm4, %v59_v20, %v55_v21 }
  0x9e   :  { %v64_v23 = vperm.slane %v60_v22, %v63_v19 }
  0xa0   :  { %67 = vst.msk [vmem:[#allocation6] sm:$0x1] %vm66_vm5, %v64_v23 }
  0xa1   :  { %78 = dma.vmem_to_hbm [thread:$0]  %s74_s1, 16, %s76_s22, [#allocation5]  }
  0xa2   :  { %142 = dma.done.wait [#allocation5], 16  }
  0xa3   :  { %143 = vsyncadd [#allocation5], 4294967280 }
  0xa4   :  { %83 = vsyncpa [#allocation4], 1 }
  0xa5   :  { %84 = vsyncpa [#allocation5], 1 }

</bundles_post_ra>
